<compile_context>
chip_gen: v7x
topology: tpu7x:2x2x1
jax: 0.10.0
libtpu: 0.0.40
codegen_flags: <defaults>
</compile_context>

<pallas_src>
import functools

import jax
import jax.numpy as jnp
from jax.experimental import pallas as pl
from jax.experimental.pallas import tpu as pltpu


def _round_up(n, m):
    return ((n + m - 1) // m) * m


def _glu_kernel(x_ref, w_ref, b_ref, o_ref):
    """x_ref: (B_blk, FE) rows (one batch per sublane row, fields packed on lanes).
    w_ref: (FE, 4*FE) = [blockdiag(trans^T) | blockdiag(trans2^T) |
                         tile(lin_trans^T)  | tile(lin_trans2^T)]
    b_ref: (1, 4*FE) matching concatenated (field-tiled) biases."""
    x = x_ref[...]                                               # (B_blk, FE) fp32
    fe = x.shape[-1]

    # Single MXU push: all four linear branches at once -> (B_blk, 4*FE).
    z = jnp.dot(x, w_ref[...], preferred_element_type=jnp.float32) + b_ref[...]

    t1 = z[:, 0 * fe:1 * fe]                                     # trans(x)
    t2 = z[:, 1 * fe:2 * fe]                                     # trans2(x)
    l1 = z[:, 2 * fe:3 * fe]                                     # lin_trans(xflat), tiled over F
    l2 = z[:, 3 * fe:4 * fe]                                     # lin_trans2(xflat), tiled over F

    g = jax.nn.sigmoid(t1 * l1)                                  # gate (EUP sigmoid, fp32)
    y2 = t2 * l2
    # x*(1-g) + y2*g  ==  x + g*(y2 - x)   (one fewer multiply)
    o_ref[...] = (x + g * (y2 - x)).astype(o_ref.dtype)


def prepare_global_glu_in2_params(wt, bt, wt2, bt2, wl, bl, wl2, bl2, field_length):
    """Hoisted parameter prep (do once, not per forward call).

    wt/wt2:  (E, E)    PyTorch Linear(E, E) weights (out_features, in_features)
    wl/wl2:  (E, F*E)  PyTorch Linear(F*E, E) weights
    Returns (w_cat, b_cat) with shapes (F*E, 4*F*E) and (1, 4*F*E)."""
    F = field_length
    E = wt.shape[0]
    eye = jnp.eye(F, dtype=wt.dtype)

    def blockdiag(w):                      # per-position linear, fields on lanes
        return jnp.kron(eye, w.T)          # (F*E, F*E)

    def tile_w(w):                         # global linear replicated per field block
        return jnp.tile(w.T, (1, F))       # (F*E, F*E)

    def tile_b(b):
        return jnp.tile(b, F)              # (F*E,)

    w_cat = jnp.concatenate(
        [blockdiag(wt), blockdiag(wt2), tile_w(wl), tile_w(wl2)], axis=1)   # (FE, 4FE)
    b_cat = jnp.concatenate(
        [tile_b(bt), tile_b(bt2), tile_b(bl), tile_b(bl2)])[None, :]        # (1, 4FE)
    return w_cat, b_cat


@functools.partial(jax.jit, static_argnames=("block_b",))
def global_glu_in2(x, w_cat, b_cat, *, block_b=512):
    """x: (B, F, E); w_cat/b_cat from prepare_global_glu_in2_params.
    Returns (B, F, E) matching GlobalGluIn2.forward."""
    B, F, E = x.shape
    FE = F * E

    xflat = x.reshape(B, FE)

    # Row (batch) tiling: block is a multiple of 8 sublanes; pad B if needed.
    bb = min(block_b, _round_up(B, 8))
    Bp = _round_up(B, bb)
    if Bp != B:
        xflat = jnp.pad(xflat, ((0, Bp - B), (0, 0)))

    out2d = pl.pallas_call(
        _glu_kernel,
        out_shape=jax.ShapeDtypeStruct((Bp, FE), x.dtype),
        grid=(Bp // bb,),
        in_specs=[
            pl.BlockSpec((bb, FE), lambda i: (i, 0)),       # activations: pipelined
            pl.BlockSpec((FE, 4 * FE), lambda i: (0, 0)),   # fused weights: resident
            pl.BlockSpec((1, 4 * FE), lambda i: (0, 0)),    # fused biases: resident
        ],
        out_specs=pl.BlockSpec((bb, FE), lambda i: (i, 0)),  # lane-dense output
        compiler_params=pltpu.CompilerParams(
            dimension_semantics=("parallel",)),              # megacore on v7x
    )(xflat, w_cat, b_cat)

    return out2d[:B].reshape(B, F, E)


def _reference(x, wt, bt, wt2, bt2, wl, bl, wl2, bl2):
    B, F, E = x.shape
    xf = x.reshape(B, F * E)
    t2 = x @ wt2.T + bt2
    l2 = (xf @ wl2.T + bl2)[:, None, :]
    y2 = t2 * l2
    t1 = x @ wt.T + bt
    l1 = (xf @ wl.T + bl)[:, None, :]
    g = jax.nn.sigmoid(t1 * l1)
    return x * (1.0 - g) + y2 * g


if __name__ == "__main__":
    # field_length=4, embed_dim=32, batch=2  ->  x: (2, 4, 32), input_dim = 128
    B, F, E = 2, 4, 32
    key = jax.random.PRNGKey(0)
    kx, k1, kb1, k2, kb2, k3, kb3, k4, kb4 = jax.random.split(key, 9)

    x = jax.random.normal(kx, (B, F, E), dtype=jnp.float32)
    # Linear weights in PyTorch layout (out_features, in_features)
    wt = jax.random.normal(k1, (E, E), dtype=jnp.float32) * 0.1
    bt = jax.random.normal(kb1, (E,), dtype=jnp.float32) * 0.1
    wt2 = jax.random.normal(k2, (E, E), dtype=jnp.float32) * 0.1
    bt2 = jax.random.normal(kb2, (E,), dtype=jnp.float32) * 0.1
    wl = jax.random.normal(k3, (E, F * E), dtype=jnp.float32) * 0.1
    bl = jax.random.normal(kb3, (E,), dtype=jnp.float32) * 0.1
    wl2 = jax.random.normal(k4, (E, F * E), dtype=jnp.float32) * 0.1
    bl2 = jax.random.normal(kb4, (E,), dtype=jnp.float32) * 0.1

    # Parameter prep is done once (hoisted out of the forward path).
    w_cat, b_cat = prepare_global_glu_in2_params(wt, bt, wt2, bt2, wl, bl, wl2, bl2, F)
    w_cat = jax.block_until_ready(w_cat)

    out = global_glu_in2(x, w_cat, b_cat)
    out = jax.block_until_ready(out)

    ref = _reference(x, wt, bt, wt2, bt2, wl, bl, wl2, bl2)
    assert out.shape == (B, F, E)
    assert jnp.allclose(out, ref, atol=2e-4, rtol=2e-4), "mismatch vs reference"

    print("KERNEL_OK")
</pallas_src>

<mosaic_0001>
module attributes {stable_mosaic.version = 11 : i64} {
  func.func @_glu_kernel(%arg0: i32, %arg1: memref<8x128xf32, #tpu.memory_space<vmem>>, %arg2: memref<128x512xf32, #tpu.memory_space<vmem>>, %arg3: memref<1x512xf32, #tpu.memory_space<vmem>>, %arg4: memref<8x128xf32, #tpu.memory_space<vmem>>) attributes {dimension_semantics = [#tpu.dimension_semantics<parallel>], iteration_bounds = array<i64: 1>, scalar_prefetch = 0 : i64, scratch_operands = 0 : i64, tpu.core_type = #tpu.core_type<tc>, window_params = [{transform_indices = @transform_0, window_bounds = array<i64: 8, 128>}, {pipeline_mode = #tpu.pipeline_mode<synchronous>, transform_indices = @transform_1, window_bounds = array<i64: 128, 512>}, {pipeline_mode = #tpu.pipeline_mode<synchronous>, transform_indices = @transform_2, window_bounds = array<i64: 1, 512>}, {transform_indices = @transform_3, window_bounds = array<i64: 8, 128>}]} {
    %c0 = arith.constant 0 : index
    %c0_0 = arith.constant 0 : index
    %0 = vector.load %arg1[%c0, %c0_0] : memref<8x128xf32, #tpu.memory_space<vmem>>, vector<8x128xf32>
    %c0_1 = arith.constant 0 : index
    %c0_2 = arith.constant 0 : index
    %1 = vector.load %arg2[%c0_1, %c0_2] : memref<128x512xf32, #tpu.memory_space<vmem>>, vector<128x512xf32>
    %cst = arith.constant dense<0.000000e+00> : vector<8x512xf32>
    %2 = tpu.matmul %0, %1, %cst {dimension_numbers = #tpu.dot_dimension_numbers<[1], [0], [0], [1], [0, 0, 1, 1], [], []>} : vector<8x128xf32>, vector<128x512xf32>, vector<8x512xf32> -> vector<8x512xf32>
    %c0_3 = arith.constant 0 : index
    %c0_4 = arith.constant 0 : index
    %3 = vector.load %arg3[%c0_3, %c0_4] : memref<1x512xf32, #tpu.memory_space<vmem>>, vector<1x512xf32>
    %4 = vector.broadcast %3 : vector<1x512xf32> to vector<8x512xf32>
    %5 = arith.addf %2, %4 : vector<8x512xf32>
    %6 = vector.extract_strided_slice %5 {offsets = [0, 0], sizes = [8, 128], strides = [1, 1]} : vector<8x512xf32> to vector<8x128xf32>
    %7 = vector.extract_strided_slice %5 {offsets = [0, 128], sizes = [8, 128], strides = [1, 1]} : vector<8x512xf32> to vector<8x128xf32>
    %8 = vector.extract_strided_slice %5 {offsets = [0, 256], sizes = [8, 128], strides = [1, 1]} : vector<8x512xf32> to vector<8x128xf32>
    %9 = vector.extract_strided_slice %5 {offsets = [0, 384], sizes = [8, 128], strides = [1, 1]} : vector<8x512xf32> to vector<8x128xf32>
    %10 = arith.mulf %6, %8 : vector<8x128xf32>
    %11 = arith.negf %10 : vector<8x128xf32>
    %12 = math.exp %11 : vector<8x128xf32>
    %cst_5 = arith.constant 1.000000e+00 : f32
    %13 = vector.broadcast %cst_5 : f32 to vector<8x128xf32>
    %14 = arith.addf %13, %12 : vector<8x128xf32>
    %15 = arith.divf %13, %14 : vector<8x128xf32>
    %16 = arith.mulf %7, %9 : vector<8x128xf32>
    %17 = arith.subf %16, %0 : vector<8x128xf32>
    %18 = arith.mulf %15, %17 : vector<8x128xf32>
    %19 = arith.addf %0, %18 : vector<8x128xf32>
    %c0_6 = arith.constant 0 : index
    %c0_7 = arith.constant 0 : index
    %20 = vector.load %arg4[%c0_6, %c0_7] : memref<8x128xf32, #tpu.memory_space<vmem>>, vector<8x128xf32>
    tpu.vector_store %arg4[%c0_6, %c0_7], %19 {strides = array<i32>} : memref<8x128xf32, #tpu.memory_space<vmem>>, vector<8x128xf32>,
    return
  }
  func.func @transform_0(%arg0: i32) -> (i32, i32) {
    %c0_i32 = arith.constant 0 : i32
    %c0_i32_0 = arith.constant 0 : i32
    return %arg0, %c0_i32 : i32, i32
  }
  func.func @transform_1(%arg0: i32) -> (i32, i32) {
    %c0_i32 = arith.constant 0 : i32
    %c0_i32_0 = arith.constant 0 : i32
    %c0_i32_1 = arith.constant 0 : i32
    return %c0_i32, %c0_i32_0 : i32, i32
  }
  func.func @transform_2(%arg0: i32) -> (i32, i32) {
    %c0_i32 = arith.constant 0 : i32
    %c0_i32_0 = arith.constant 0 : i32
    %c0_i32_1 = arith.constant 0 : i32
    return %c0_i32, %c0_i32_0 : i32, i32
  }
  func.func @transform_3(%arg0: i32) -> (i32, i32) {
    %c0_i32 = arith.constant 0 : i32
    %c0_i32_0 = arith.constant 0 : i32
    return %arg0, %c0_i32 : i32, i32
  }
}

</mosaic_0001>

<bundles_post_ra>
// kernel: global_glu_in2.1
= control target key start
LH: loop header
LB: loop body
LE: loop exit
PB: predicated region body
PF: predicated region fallthrough
CT: control target
= control target key end

     0   :  { %8 = vsyncpa [#allocation3], 0  ;;  %s371_s12 = smov [#allocation2]   ;;  %s416_s0 = inlined_call_operand.vmem [shape: f32[8,128], index: 0, kind: input, shape index: {}]   ;;  %s417_s1 = inlined_call_operand.hbm [shape: f32[128,512], index: 1, kind: input, shape index: {}]   ;;  %s418_s2 = inlined_call_operand.vmem [shape: f32[1,512], index: 2, kind: input, shape index: {}]   ;;  %s419_s3 = inlined_call_operand.vmem [shape: f32[8,128], index: 3, kind: output, shape index: {}]  }
   0x1   :  { %s16_s13 = sshll.u32 %s371_s12, 4  ;;  %s347_s16 = scalar_lea.hbm %s417_s1, 8192  ;;  %s17_s13 = int_to_ptr.vmem [resolvable:$true] %s16_s13 }
   0x2   :  { %p348_p0 = scmp.ne.s32.totalorder %s417_s1, %s347_s16  ;;  %p351_p1 = scmp.lt.u32.totalorder %s347_s16, %s417_s1 }
   0x4   :  { %p353_p2 = pnand %p351_p1, %p348_p0 }
   0x6   :  { %356 = shalt.err (!%p353_p2)
}
   0x7   :  { %s357_s21 = scalar_lea.vmem %s17_s13, 8192  ;;  %p362_p4 = scmp.lt.s32.totalorder %s17_s13, %s17_s13 }
   0x8   :  { %p358_p3 = scmp.ne.s32.totalorder %s17_s13, %s357_s21  ;;  %p363_p5 = scmp.lt.s32.totalorder %s357_s21, %s357_s21 }
   0xa   :  { %p364_p6 = por %p363_p5, %p362_p4 }
   0xc   :  { %p365_p7 = pnand %p364_p6, %p358_p3 }
   0xe   :  { %368 = shalt.err (!%p365_p7)
}
   0xf   :  { %s372_s22 = smov 512   ;;  %s373_s23 = smov 32  }
  0x10   :  { %22 = dma.hbm_to_vmem [thread:$0]  %s417_s1, 8192, %s17_s13, [#allocation3], %s372_s22, %s372_s22, %s373_s23  }
  0x11   :  { %369 = dma.done.wait [#allocation3], 8192  }
  0x12   :  { %370 = vsyncadd [#allocation3], 4294959104  ;;  %v374_v0 = vmov 0.0   ;;  %v30_v1 = vld [vmem:[#allocation2 + $0x8] sm:$0xff]  ;;  %v32_v3 = vld [vmem:[#allocation2 + $0x18] sm:$0xff] }
  0x13   :  { %179 = vmatprep.mubr.f32.mxu0 %v374_v0  ;;  %250 = vmatprep.mubr.f32.mxu1 %v374_v0  ;;  %v34_v2 = vld [vmem:[#allocation2 + $0x28] sm:$0xff]  ;;  %v36_v5 = vld [vmem:[#allocation2 + $0x38] sm:$0xff]  ;;  %v29_v6 = vld [vmem:[#allocation2] sm:$0xff] }
  0x14   :  { %v275_v4 = vpack.c.bf16 %v34_v2, %v30_v1  ;;  %v33_v7 = vld [vmem:[#allocation2 + $0x20] sm:$0xff]  ;;  %v307_v8 = vpack.c.bf16 %v36_v5, %v32_v3  ;;  %v31_v10 = vld [vmem:[#allocation2 + $0x10] sm:$0xff]  ;;  %v38_v12 = vld [vmem:[#allocation2 + $0x48] sm:$0xff] }
  0x15   :  { %v277_v9 = vpack.c.bf16 %v33_v7, %v29_v6  ;;  %v35_v11 = vld [vmem:[#allocation2 + $0x30] sm:$0xff]  ;;  %v42_v14 = vld [vmem:[#allocation2 + $0x68] sm:$0xff]  ;;  %v40_v15 = vld [vmem:[#allocation2 + $0x58] sm:$0xff] }
  0x16   :  { %276 = vmatprep.subr.bf16.mxu0 %v275_v4  ;;  %v309_v13 = vpack.c.bf16 %v35_v11, %v31_v10  ;;  %v44_v16 = vld [vmem:[#allocation2 + $0x78] sm:$0xff]  ;;  %308 = vmatprep.subr.bf16.mxu1 %v307_v8  ;;  %v279_v17 = vpack.c.bf16 %v42_v14, %v38_v12  ;;  %v37_v19 = vld [vmem:[#allocation2 + $0x40] sm:$0xff]  ;;  %v39_v21 = vld [vmem:[#allocation2 + $0x50] sm:$0xff] }
  0x17   :  { %278 = vmatpush1.bf16.msra.mxu0 %v277_v9  ;;  %v311_v18 = vpack.c.bf16 %v44_v16, %v40_v15  ;;  %v41_v20 = vld [vmem:[#allocation2 + $0x60] sm:$0xff]  ;;  %v43_v23 = vld [vmem:[#allocation2 + $0x70] sm:$0xff]  ;;  %v46_v24 = vld [vmem:[#allocation2 + $0x88] sm:$0xff] }
  0x18   :  { %310 = vmatpush1.bf16.msra.mxu1 %v309_v13  ;;  %v281_v22 = vpack.c.bf16 %v41_v20, %v37_v19  ;;  %v50_v25 = vld [vmem:[#allocation2 + $0xa8] sm:$0xff]  ;;  %280 = vmatprep.subr.bf16.mxu0 %v279_v17  ;;  %v313_v26 = vpack.c.bf16 %v43_v23, %v39_v21  ;;  %v48_v28 = vld [vmem:[#allocation2 + $0x98] sm:$0xff]  ;;  %v45_v30 = vld [vmem:[#allocation2 + $0x80] sm:$0xff] }
  0x19   :  { %312 = vmatprep.subr.bf16.mxu1 %v311_v18  ;;  %v283_v27 = vpack.c.bf16 %v50_v25, %v46_v24  ;;  %v52_v29 = vld [vmem:[#allocation2 + $0xb8] sm:$0xff]  ;;  %v49_v32 = vld [vmem:[#allocation2 + $0xa0] sm:$0xff]  ;;  %v47_v33 = vld [vmem:[#allocation2 + $0x90] sm:$0xff] }
  0x1a   :  { %v315_v31 = vpack.c.bf16 %v52_v29, %v48_v28  ;;  %v51_v34 = vld [vmem:[#allocation2 + $0xb0] sm:$0xff]  ;;  %v285_v35 = vpack.c.bf16 %v49_v32, %v45_v30  ;;  %v54_v36 = vld [vmem:[#allocation2 + $0xc8] sm:$0xff]  ;;  %v56_v38 = vld [vmem:[#allocation2 + $0xd8] sm:$0xff] }
  0x1b   :  { %282 = vmatpush1.bf16.msra.mxu0 %v281_v22  ;;  %v58_v37 = vld [vmem:[#allocation2 + $0xe8] sm:$0xff]  ;;  %v317_v39 = vpack.c.bf16 %v51_v34, %v47_v33  ;;  %v60_v41 = vld [vmem:[#allocation2 + $0xf8] sm:$0xff]  ;;  %v53_v42 = vld [vmem:[#allocation2 + $0xc0] sm:$0xff]  ;;  %v95_v34 = vlaneseq }
  0x1c   :  { %314 = vmatpush1.bf16.msra.mxu1 %v313_v26  ;;  %284 = vmatprep.subr.bf16.mxu0 %v283_v27  ;;  %v287_v40 = vpack.c.bf16 %v58_v37, %v54_v36  ;;  %v57_v43 = vld [vmem:[#allocation2 + $0xe0] sm:$0xff]  ;;  %v319_v44 = vpack.c.bf16 %v60_v41, %v56_v38  ;;  %v55_v45 = vld [vmem:[#allocation2 + $0xd0] sm:$0xff]  ;;  %v62_v47 = vld [vmem:[#allocation2 + $0x108] sm:$0xff] }
  0x1d   :  { %316 = vmatprep.subr.bf16.mxu1 %v315_v31  ;;  %v59_v46 = vld [vmem:[#allocation2 + $0xf0] sm:$0xff]  ;;  %v66_v48 = vld [vmem:[#allocation2 + $0x128] sm:$0xff]  ;;  %v64_v49 = vld [vmem:[#allocation2 + $0x118] sm:$0xff]  ;;  %v289_v51 = vpack.c.bf16 %v57_v43, %v53_v42 }
  0x1e   :  { %v68_v50 = vld [vmem:[#allocation2 + $0x138] sm:$0xff]  ;;  %v321_v52 = vpack.c.bf16 %v59_v46, %v55_v45  ;;  %v291_v53 = vpack.c.bf16 %v66_v48, %v62_v47  ;;  %v61_v54 = vld [vmem:[#allocation2 + $0x100] sm:$0xff]  ;;  %v63_v56 = vld [vmem:[#allocation2 + $0x110] sm:$0xff] }
  0x1f   :  { %286 = vmatpush1.bf16.msra.mxu0 %v285_v35  ;;  %v65_v55 = vld [vmem:[#allocation2 + $0x120] sm:$0xff]  ;;  %v323_v57 = vpack.c.bf16 %v68_v50, %v64_v49  ;;  %v67_v58 = vld [vmem:[#allocation2 + $0x130] sm:$0xff]  ;;  %v70_v59 = vld [vmem:[#allocation2 + $0x148] sm:$0xff]  ;;  %v96_v35 = vshrl.u32 %v95_v34, 7 }
  0x20   :  { %318 = vmatpush1.bf16.msra.mxu1 %v317_v39  ;;  %288 = vmatprep.subr.bf16.mxu0 %v287_v40  ;;  %v74_v60 = vld [vmem:[#allocation2 + $0x168] sm:$0xff]  ;;  %v72_v61 = vld [vmem:[#allocation2 + $0x158] sm:$0xff]  ;;  %v293_v63 = vpack.c.bf16 %v65_v55, %v61_v54  ;;  %v325_v0 = vpack.c.bf16 %v67_v58, %v63_v56  ;;  %v69_v2 = vld [vmem:[#allocation2 + $0x140] sm:$0xff] }
  0x21   :  { %320 = vmatprep.subr.bf16.mxu1 %v319_v44  ;;  %v76_v62 = vld [vmem:[#allocation2 + $0x178] sm:$0xff]  ;;  %v295_v1 = vpack.c.bf16 %v74_v60, %v70_v59  ;;  %v73_v3 = vld [vmem:[#allocation2 + $0x160] sm:$0xff]  ;;  %v71_v4 = vld [vmem:[#allocation2 + $0x150] sm:$0xff]  ;;  %v97_v36 = vsub.s32 0, %v96_v35  ;;  %v105_v38 = vsub.s32 2, %v96_v35  ;;  %v101_v39 = vsub.s32 1, %v96_v35 }
  0x22   :  { %v327_v5 = vpack.c.bf16 %v76_v62, %v72_v61  ;;  %v75_v6 = vld [vmem:[#allocation2 + $0x170] sm:$0xff]  ;;  %v78_v7 = vld [vmem:[#allocation2 + $0x188] sm:$0xff]  ;;  %v80_v9 = vld [vmem:[#allocation2 + $0x198] sm:$0xff]  ;;  %v297_v11 = vpack.c.bf16 %v73_v3, %v69_v2  ;;  %v109_v40 = vsub.s32 3, %v96_v35 }
  0x23   :  { %290 = vmatpush1.bf16.msra.mxu0 %v289_v51  ;;  %v82_v8 = vld [vmem:[#allocation2 + $0x1a8] sm:$0xff]  ;;  %v84_v10 = vld [vmem:[#allocation2 + $0x1b8] sm:$0xff]  ;;  %v329_v12 = vpack.c.bf16 %v75_v6, %v71_v4  ;;  %v77_v14 = vld [vmem:[#allocation2 + $0x180] sm:$0xff] }
  0x24   :  { %322 = vmatpush1.bf16.msra.mxu1 %v321_v52  ;;  %292 = vmatprep.subr.bf16.mxu0 %v291_v53  ;;  %v299_v13 = vpack.c.bf16 %v82_v8, %v78_v7  ;;  %v81_v15 = vld [vmem:[#allocation2 + $0x1a0] sm:$0xff]  ;;  %v79_v16 = vld [vmem:[#allocation2 + $0x190] sm:$0xff]  ;;  %v331_v17 = vpack.c.bf16 %v84_v10, %v80_v9  ;;  %v86_v19 = vld [vmem:[#allocation2 + $0x1c8] sm:$0xff] }
  0x25   :  { %324 = vmatprep.subr.bf16.mxu1 %v323_v57  ;;  %v83_v18 = vld [vmem:[#allocation2 + $0x1b0] sm:$0xff]  ;;  %v90_v20 = vld [vmem:[#allocation2 + $0x1e8] sm:$0xff]  ;;  %v88_v21 = vld [vmem:[#allocation2 + $0x1d8] sm:$0xff]  ;;  %v301_v23 = vpack.c.bf16 %v81_v15, %v77_v14 }
  0x26   :  { %v92_v22 = vld [vmem:[#allocation2 + $0x1f8] sm:$0xff]  ;;  %v333_v24 = vpack.c.bf16 %v83_v18, %v79_v16  ;;  %v303_v25 = vpack.c.bf16 %v90_v20, %v86_v19  ;;  %v85_v26 = vld [vmem:[#allocation2 + $0x1c0] sm:$0xff]  ;;  %v87_v29 = vld [vmem:[#allocation2 + $0x1d0] sm:$0xff] }
  0x27   :  { %294 = vmatpush1.bf16.msra.mxu0 %v293_v63  ;;  %v89_v27 = vld [vmem:[#allocation2 + $0x1e0] sm:$0xff]  ;;  %v335_v28 = vpack.c.bf16 %v92_v22, %v88_v21  ;;  %v91_v30 = vld [vmem:[#allocation2 + $0x1f0] sm:$0xff] }
  0x28   :  { %326 = vmatpush1.bf16.msra.mxu1 %v325_v0  ;;  %296 = vmatprep.subr.bf16.mxu0 %v295_v1  ;;  %v305_v31 = vpack.c.bf16 %v89_v27, %v85_v26  ;;  %v337_v32 = vpack.c.bf16 %v91_v30, %v87_v29  ;;  %v28_v33 = vld [vmem:[%s416_s0] sm:$0xff] }
  0x29   :  { %328 = vmatprep.subr.bf16.mxu1 %v327_v5  ;;  %v93_v37 = vld [vmem:[%s418_s2] sm:$0xf] }
  0x2a   :  { %v98_v41 = vrot.slane %v93_v37, %v97_v36  ;;  %v106_v42 = vrot.slane %v93_v37, %v105_v38  ;;  %v102_v43 = vrot.slane %v93_v37, %v101_v39  ;;  %v110_v44 = vrot.slane %v93_v37, %v109_v40 }
  0x2b   :  { %298 = vmatpush1.bf16.msra.mxu0 %v297_v11 }
  0x2c   :  { %330 = vmatpush1.bf16.msra.mxu1 %v329_v12  ;;  %300 = vmatprep.subr.bf16.mxu0 %v299_v13 }
  0x2d   :  { %332 = vmatprep.subr.bf16.mxu1 %v331_v17 }
  0x2f   :  { %302 = vmatpush1.bf16.msra.mxu0 %v301_v23 }
  0x30   :  { %334 = vmatpush1.bf16.msra.mxu1 %v333_v24  ;;  %304 = vmatprep.subr.bf16.mxu0 %v303_v25 }
  0x31   :  { %336 = vmatprep.subr.bf16.mxu1 %v335_v28 }
  0x33   :  { %306 = vmatpush1.bf16.msra.mxu0 %v305_v31 }
  0x34   :  { %338 = vmatpush1.bf16.msra.mxu1 %v337_v32 }
  0x36   :  { %180 = vmatmul.mubr.f32.vlgmr.msra.gmra.mrb[0].mxu0 %v28_v33 }
  0x37   :  { %251 = vmatmul.mubr.f32.vlgmr.msra.gmra.mrb[0].mxu1 %v28_v33 }
 0x109   :  { %v181_v45 = vpop.f32.mrb[0].mxu0 }
 0x10a   :  { %v182_v46 = vadd.f32 %v181_v45, %v98_v41  ;;  %v252_v47 = vpop.f32.mrb[0].mxu1  ;;  %v183_v48 = vpop.f32.mrb[1].mxu0 }
 0x10b   :  { %v253_v49 = vadd.f32 %v252_v47, %v106_v42  ;;  %v184_v50 = vadd.f32 %v183_v48, %v102_v43  ;;  %v254_v51 = vpop.f32.mrb[1].mxu1 }
 0x10c   :  { %v255_v52 = vadd.f32 %v254_v51, %v110_v44 }
 0x10d   :  { %v257_v53 = vmul.f32 %v253_v49, %v182_v46 }
 0x10e   :  { %v264_v54 = vmul.f32 %v255_v52, %v184_v50 }
 0x10f   :  { %v274_v55 = vmul.f32 -1.442695, %v257_v53 }
 0x110   :  { %v265_v58 = vsub.f32 %v264_v54, %v28_v33 }
 0x111   :  { %343 = vpow2.f32 %v274_v55 }
 0x11b   :  { %v344_v56 = vpop.eup %343 }
 0x11c   :  { %v261_v57 = vadd.f32 1.0, %v344_v56 }
 0x11e   :  { %345 = vrcp.f32 %v261_v57 }
 0x128   :  { %v346_v59 = vpop.eup %345 }
 0x129   :  { %v266_v60 = vmul.f32 %v346_v59, %v265_v58 }
 0x12b   :  { %v267_v61 = vadd.f32 %v266_v60, %v28_v33 }
 0x12d   :  { %268 = vst [vmem:[%s419_s3] sm:$0xff] %v267_v61 }
 0x12e   :  { %273 = vsyncpa [#allocation3], 1 }

</bundles_post_ra>
